<compile_context>
chip_gen: v5e
topology: v5e:2x2
jax: 0.10.0
libtpu: 0.0.40
codegen_flags: <defaults>
</compile_context>

<pallas_src>
import jax
import jax.numpy as jnp
from jax.experimental import pallas as pl
from jax.experimental.pallas import tpu as pltpu


def _round_up(x, m):
    return ((x + m - 1) // m) * m


def _self_attention_kernel(x_ref, w1_ref, b1_ref, w2_ref, out_ref, wts_ref):
    tb, s, h = x_ref.shape
    p = w1_ref.shape[1]

    x = x_ref[...]                                            # (TB, S, H)

    # --- projection stage 1: Linear(H -> P) + ReLU, folded into MXU M dim ---
    x2 = x.reshape(tb * s, h)                                 # (TB*S, H), layout-free
    hid = jnp.dot(x2, w1_ref[...],
                  preferred_element_type=jnp.float32)         # (TB*S, P)
    hid = jnp.maximum(hid + b1_ref[...], 0.0)                 # ReLU

    # --- projection stage 2: Linear(P -> 1) as VPU multiply + lane reduce ---
    # (b2 omitted: constant shift of every energy, a softmax no-op.)
    e = jnp.sum(hid.reshape(tb, s, p) * w2_ref[...], axis=-1)  # (TB, S) lane-dense

    # --- softmax over the sequence axis ---
    m = jnp.max(e, axis=-1, keepdims=True)                    # (TB, 1)
    pexp = jnp.exp(e - m)                                     # (TB, S)
    denom = jnp.sum(pexp, axis=-1, keepdims=True)             # (TB, 1)
    r = pl.reciprocal(denom, approx=True)                     # EUP vrcp (free slot)
    r = r * (2.0 - denom * r)                                 # 1 Newton step -> f32 exact
    w = pexp * r                                              # (TB, S)

    # --- weighted sum over sequence: (TB,S,H) * (TB,S,1) -> (TB,H) ---
    out = jnp.sum(x * w[:, :, None], axis=1)                  # (TB, H)

    out_ref[...] = out.astype(out_ref.dtype)
    wts_ref[...] = w.astype(wts_ref.dtype)


def self_attention(x, w1, b1, w2, b2=None, *, batch_tile=None):
    """x: (B, S, H) f32; w1: (H, P); b1: (1, P); w2: (P, 1); b2: (1, 1).

    Returns (outputs (B, H), weights (B, S)).  b2 is accepted for API parity
    with the PyTorch module but is mathematically irrelevant (softmax shift
    invariance), so it is not passed to the kernel.
    """
    del b2
    B, S, H = x.shape
    P = w1.shape[1]

    # Choose TB (batch elements per grid step):
    #  * carry ~1024 (batch*seq) MXU rows per step to amortize grid overhead,
    #  * multiple of 8 (sublane tiling of the (TB, H) / (TB, S) output blocks),
    #  * keep the double-buffered x tile under ~8 MiB (fits v5e's 16 MiB
    #    scoped-VMEM default without raising vmem_limit_bytes),
    #  * keep >= 2 grid steps when B is large (v7x has two TensorCores).
    if batch_tile is None:
        target_rows = 1024
        batch_tile = max(8, (target_rows // max(S, 1)) // 8 * 8)
    x_row_bytes = S * H * 4
    vmem_cap_tb = max(8, ((8 * 1024 * 1024) // (2 * x_row_bytes)) // 8 * 8)
    batch_tile = min(batch_tile, vmem_cap_tb)
    if B >= 16:
        batch_tile = min(batch_tile, _round_up((B + 1) // 2, 8))
    batch_tile = min(batch_tile, _round_up(B, 8))

    Bp = _round_up(B, batch_tile)
    if Bp != B:
        x = jnp.pad(x, ((0, Bp - B), (0, 0), (0, 0)))

    w2_row = w2.reshape(1, P)      # lane-dense row for the VPU second projection
    b1 = b1.reshape(1, P)

    grid = (Bp // batch_tile,)

    out_shapes = (
        jax.ShapeDtypeStruct((Bp, H), jnp.float32),
        jax.ShapeDtypeStruct((Bp, S), jnp.float32),
    )

    grid_spec = pltpu.PrefetchScalarGridSpec(
        num_scalar_prefetch=0,
        grid=grid,
        in_specs=[
            pl.BlockSpec((batch_tile, S, H), lambda i: (i, 0, 0)),  # x tile
            pl.BlockSpec((H, P), lambda i: (0, 0)),                 # W1 (resident)
            pl.BlockSpec((1, P), lambda i: (0, 0)),                 # b1
            pl.BlockSpec((1, P), lambda i: (0, 0)),                 # w2 row
        ],
        out_specs=[
            pl.BlockSpec((batch_tile, H), lambda i: (i, 0)),        # outputs
            pl.BlockSpec((batch_tile, S), lambda i: (i, 0)),        # weights
        ],
    )

    flops = 2 * Bp * S * H * P + 2 * Bp * S * P + 2 * Bp * S * H
    bytes_accessed = 4 * (Bp * S * H + H * P + 2 * P + Bp * H + Bp * S)
    cost = pl.CostEstimate(flops=flops,
                           transcendentals=Bp * S + Bp,
                           bytes_accessed=bytes_accessed)

    # TODO(synk): for very small H/S the (TB, H)/(TB, S) stores are still
    # sub-128-lane masked stores; padding the last dim to 128 in the wrapper
    # would widen them further if this ever becomes store-slot bound.
    outputs, weights = pl.pallas_call(
        _self_attention_kernel,
        out_shape=out_shapes,
        grid_spec=grid_spec,
        compiler_params=pltpu.CompilerParams(
            dimension_semantics=("parallel",)),
        cost_estimate=cost,
    )(x, w1, b1, w2_row)

    return outputs[:B], weights[:B]


def self_attention_ref(x, w1, b1, w2, b2):
    """Pure-JAX reference matching the PyTorch module."""
    h = jnp.maximum(jnp.einsum("bsh,hp->bsp", x, w1) + b1, 0.0)      # (B, S, P)
    e = jnp.sum(h * w2.reshape(1, 1, -1), axis=-1) + b2.reshape(())  # (B, S)
    weights = jax.nn.softmax(e, axis=1)                              # (B, S)
    outputs = jnp.sum(x * weights[..., None], axis=1)                # (B, H)
    return outputs, weights


if __name__ == "__main__":
    B, S, H, P = 2, 8, 32, 64

    key = jax.random.PRNGKey(0)
    kx, kw1, kb1, kw2, kb2 = jax.random.split(key, 5)

    x = jax.random.normal(kx, (B, S, H), dtype=jnp.float32)
    # Synthetic parameters with nn.Linear(H,64) / nn.Linear(64,1) shapes.
    w1 = jax.random.normal(kw1, (H, P), dtype=jnp.float32) * 0.1
    b1 = jax.random.normal(kb1, (1, P), dtype=jnp.float32) * 0.1
    w2 = jax.random.normal(kw2, (P, 1), dtype=jnp.float32) * 0.1
    b2 = jax.random.normal(kb2, (1, 1), dtype=jnp.float32) * 0.1

    outputs, weights = self_attention(x, w1, b1, w2, b2)
    jax.block_until_ready((outputs, weights))

    ref_out, ref_w = self_attention_ref(x, w1, b1, w2, b2)
    assert outputs.shape == (B, H) and weights.shape == (B, S)
    assert jnp.allclose(outputs, ref_out, atol=1e-5, rtol=1e-5)
    assert jnp.allclose(weights, ref_w, atol=1e-5, rtol=1e-5)
    assert jnp.allclose(jnp.sum(weights, axis=1), 1.0, atol=1e-5)

    print("KERNEL_OK")
</pallas_src>

<mosaic_0001>
module attributes {stable_mosaic.version = 11 : i64} {
  func.func @_self_attention_kernel(%arg0: i32, %arg1: memref<8x8x32xf32, #tpu.memory_space<vmem>>, %arg2: memref<32x64xf32, #tpu.memory_space<vmem>>, %arg3: memref<1x64xf32, #tpu.memory_space<vmem>>, %arg4: memref<1x64xf32, #tpu.memory_space<vmem>>, %arg5: memref<8x32xf32, #tpu.memory_space<vmem>>, %arg6: memref<8x8xf32, #tpu.memory_space<vmem>>) attributes {dimension_semantics = [#tpu.dimension_semantics<parallel>], iteration_bounds = array<i64: 1>, scalar_prefetch = 0 : i64, scratch_operands = 0 : i64, tpu.core_type = #tpu.core_type<tc>, window_params = [{transform_indices = @transform_0, window_bounds = array<i64: 8, 8, 32>}, {pipeline_mode = #tpu.pipeline_mode<synchronous>, transform_indices = @transform_1, window_bounds = array<i64: 32, 64>}, {pipeline_mode = #tpu.pipeline_mode<synchronous>, transform_indices = @transform_2, window_bounds = array<i64: 1, 64>}, {pipeline_mode = #tpu.pipeline_mode<synchronous>, transform_indices = @transform_3, window_bounds = array<i64: 1, 64>}, {transform_indices = @transform_4, window_bounds = array<i64: 8, 32>}, {transform_indices = @transform_5, window_bounds = array<i64: 8, 8>}]} {
    %c0 = arith.constant 0 : index
    %c0_0 = arith.constant 0 : index
    %c0_1 = arith.constant 0 : index
    %0 = vector.load %arg1[%c0, %c0_0, %c0_1] : memref<8x8x32xf32, #tpu.memory_space<vmem>>, vector<8x8x32xf32>
    %1 = vector.shape_cast %0 : vector<8x8x32xf32> to vector<64x32xf32>
    %c0_2 = arith.constant 0 : index
    %c0_3 = arith.constant 0 : index
    %2 = vector.load %arg2[%c0_2, %c0_3] : memref<32x64xf32, #tpu.memory_space<vmem>>, vector<32x64xf32>
    %cst = arith.constant dense<0.000000e+00> : vector<64x64xf32>
    %3 = tpu.matmul %1, %2, %cst {dimension_numbers = #tpu.dot_dimension_numbers<[1], [0], [0], [1], [0, 0, 1, 1], [], []>} : vector<64x32xf32>, vector<32x64xf32>, vector<64x64xf32> -> vector<64x64xf32>
    %c0_4 = arith.constant 0 : index
    %c0_5 = arith.constant 0 : index
    %4 = vector.load %arg3[%c0_4, %c0_5] : memref<1x64xf32, #tpu.memory_space<vmem>>, vector<1x64xf32>
    %5 = vector.broadcast %4 : vector<1x64xf32> to vector<64x64xf32>
    %6 = arith.addf %3, %5 : vector<64x64xf32>
    %cst_6 = arith.constant 0.000000e+00 : f32
    %7 = vector.broadcast %cst_6 : f32 to vector<64x64xf32>
    %8 = arith.maximumf %6, %7 : vector<64x64xf32>
    %9 = vector.shape_cast %8 : vector<64x64xf32> to vector<8x8x64xf32>
    %c0_7 = arith.constant 0 : index
    %c0_8 = arith.constant 0 : index
    %10 = vector.load %arg4[%c0_7, %c0_8] : memref<1x64xf32, #tpu.memory_space<vmem>>, vector<1x64xf32>
    %11 = vector.shape_cast %10 : vector<1x64xf32> to vector<1x1x64xf32>
    %12 = vector.broadcast %11 : vector<1x1x64xf32> to vector<8x8x64xf32>
    %13 = arith.mulf %9, %12 : vector<8x8x64xf32>
    %cst_9 = arith.constant dense<0.000000e+00> : vector<8x8xf32>
    %14 = vector.multi_reduction <add>, %13, %cst_9 [2] : vector<8x8x64xf32> to vector<8x8xf32>
    %cst_10 = arith.constant dense<0xFF800000> : vector<8xf32>
    %15 = vector.multi_reduction <maximumf>, %14, %cst_10 [1] : vector<8x8xf32> to vector<8xf32>
    %16 = vector.shape_cast %15 : vector<8xf32> to vector<8x1xf32>
    %17 = vector.broadcast %16 : vector<8x1xf32> to vector<8x8xf32>
    %18 = arith.subf %14, %17 : vector<8x8xf32>
    %19 = math.exp %18 : vector<8x8xf32>
    %cst_11 = arith.constant dense<0.000000e+00> : vector<8xf32>
    %20 = vector.multi_reduction <add>, %19, %cst_11 [1] : vector<8x8xf32> to vector<8xf32>
    %21 = vector.shape_cast %20 : vector<8xf32> to vector<8x1xf32>
    %22 = tpu.reciprocal %21 {approx = true} : vector<8x1xf32> -> vector<8x1xf32>
    %23 = arith.mulf %21, %22 : vector<8x1xf32>
    %cst_12 = arith.constant 2.000000e+00 : f32
    %24 = vector.broadcast %cst_12 : f32 to vector<8x1xf32>
    %25 = arith.subf %24, %23 : vector<8x1xf32>
    %26 = arith.mulf %22, %25 : vector<8x1xf32>
    %27 = vector.broadcast %26 : vector<8x1xf32> to vector<8x8xf32>
    %28 = arith.mulf %19, %27 : vector<8x8xf32>
    %29 = vector.shape_cast %28 : vector<8x8xf32> to vector<8x8x1xf32>
    %30 = vector.broadcast %29 : vector<8x8x1xf32> to vector<8x8x32xf32>
    %31 = arith.mulf %0, %30 : vector<8x8x32xf32>
    %cst_13 = arith.constant dense<0.000000e+00> : vector<8x32xf32>
    %32 = vector.multi_reduction <add>, %31, %cst_13 [1] : vector<8x8x32xf32> to vector<8x32xf32>
    %c0_14 = arith.constant 0 : index
    %c0_15 = arith.constant 0 : index
    %33 = vector.load %arg5[%c0_14, %c0_15] : memref<8x32xf32, #tpu.memory_space<vmem>>, vector<8x32xf32>
    tpu.vector_store %arg5[%c0_14, %c0_15], %32 {strides = array<i32>} : memref<8x32xf32, #tpu.memory_space<vmem>>, vector<8x32xf32>,
    %c0_16 = arith.constant 0 : index
    %c0_17 = arith.constant 0 : index
    %34 = vector.load %arg6[%c0_16, %c0_17] : memref<8x8xf32, #tpu.memory_space<vmem>>, vector<8x8xf32>
    tpu.vector_store %arg6[%c0_16, %c0_17], %28 {strides = array<i32>} : memref<8x8xf32, #tpu.memory_space<vmem>>, vector<8x8xf32>,
    return
  }
  func.func @transform_0(%arg0: i32) -> (i32, i32, i32) {
    %c0_i32 = arith.constant 0 : i32
    %c0_i32_0 = arith.constant 0 : i32
    %c0_i32_1 = arith.constant 0 : i32
    return %arg0, %c0_i32, %c0_i32_0 : i32, i32, i32
  }
  func.func @transform_1(%arg0: i32) -> (i32, i32) {
    %c0_i32 = arith.constant 0 : i32
    %c0_i32_0 = arith.constant 0 : i32
    %c0_i32_1 = arith.constant 0 : i32
    return %c0_i32, %c0_i32_0 : i32, i32
  }
  func.func @transform_2(%arg0: i32) -> (i32, i32) {
    %c0_i32 = arith.constant 0 : i32
    %c0_i32_0 = arith.constant 0 : i32
    %c0_i32_1 = arith.constant 0 : i32
    return %c0_i32, %c0_i32_0 : i32, i32
  }
  func.func @transform_3(%arg0: i32) -> (i32, i32) {
    %c0_i32 = arith.constant 0 : i32
    %c0_i32_0 = arith.constant 0 : i32
    %c0_i32_1 = arith.constant 0 : i32
    return %c0_i32, %c0_i32_0 : i32, i32
  }
  func.func @transform_4(%arg0: i32) -> (i32, i32) {
    %c0_i32 = arith.constant 0 : i32
    %c0_i32_0 = arith.constant 0 : i32
    return %arg0, %c0_i32 : i32, i32
  }
  func.func @transform_5(%arg0: i32) -> (i32, i32) {
    %c0_i32 = arith.constant 0 : i32
    %c0_i32_0 = arith.constant 0 : i32
    return %arg0, %c0_i32 : i32, i32
  }
}

</mosaic_0001>

<bundles_post_ra>
// kernel: tpu_custom_call.1
= control target key start
LH: loop header
LB: loop body
LE: loop exit
PB: predicated region body
PF: predicated region fallthrough
CT: control target
= control target key end

     0   :  { %11 = vsyncpa [#allocation3], 0  ;;  %s837_s0 = inlined_call_operand.hbm [shape: f32[8,8,32], index: 0, kind: input, shape index: {}]   ;;  %s838_s1 = inlined_call_operand.hbm [shape: f32[32,64], index: 1, kind: input, shape index: {}]   ;;  %s839_s2 = inlined_call_operand.vmem [shape: f32[1,64], index: 2, kind: input, shape index: {}]   ;;  %s840_s3 = inlined_call_operand.vmem [shape: f32[1,64], index: 3, kind: input, shape index: {}]   ;;  %s841_s4 = inlined_call_operand.hbm [shape: f32[8,32], index: 4, kind: output, shape index: {0}]   ;;  %s842_s5 = inlined_call_operand.hbm [shape: f32[8,8], index: 5, kind: output, shape index: {1}]  }
   0x1   :  { %12 = vsyncpa [#allocation6], 0 }
   0x2   :  { %13 = vsyncpa [#allocation4], 0 }
   0x3   :  { %14 = vsyncpa [#allocation9], 0  ;;  %s19_s20 = sshll.u32 %s837_s0, 4  ;;  %s664_s21 = smov [#allocation2]   ;;  %s20_s20 = int_to_ptr.hbm [resolvable:$true] %s19_s20 }
   0x4   :  { %s21_s22 = sshll.u32 %s664_s21, 4  ;;  %s32_s25 = sshll.u32 %s838_s1, 4  ;;  %s22_s22 = int_to_ptr.vmem [resolvable:$true] %s21_s22  ;;  %s33_s25 = int_to_ptr.hbm [resolvable:$true] %s32_s25 }
   0x5   :  { %s665_s26 = smov 128   ;;  %s666_s27 = smov 8  }
   0x6   :  { %27 = dma.hbm_to_vmem [thread:$0]  %s20_s20, 1024, %s22_s22, [#allocation3], %s665_s26, %s665_s26, %s666_s27  }
   0x7   :  { %s667_s28 = smov [#allocation5]  }
   0x8   :  { %s34_s29 = sshll.u32 %s667_s28, 4  ;;  %s35_s29 = int_to_ptr.vmem [resolvable:$true] %s34_s29 }
   0x9   :  { %40 = dma.hbm_to_vmem [thread:$0]  %s33_s25, 512, %s35_s29, [#allocation6], %s665_s26, %s665_s26, %s666_s27  }
   0xa   :  { %656 = dma.done.wait [#allocation3], 1024  }
   0xb   :  { %657 = vsyncadd [#allocation3], 4294966272 }
   0xc   :  { %658 = dma.done.wait [#allocation6], 512  }
   0xd   :  { %659 = vsyncadd [#allocation6], 4294966784  ;;  %v64_v0 = vld [vmem:[#allocation5 + $0x18] sm:$0xff]  ;;  %v63_v1 = vld [vmem:[#allocation5 + $0x10] sm:$0xff]  ;;  %vm69_vm0 = vcmask 261120   ;;  %vm155_vm1 = vcmask 523264   ;;  %v188_v55 = vlaneseq }
   0xe   :  { %106 = vmatpush.msra.mxu0 %v64_v0  ;;  %519 = vmatpush.msra.mxu2 %v64_v0  ;;  %v62_v2 = vld [vmem:[#allocation5 + $0x8] sm:$0xff]  ;;  %v61_v3 = vld [vmem:[#allocation5] sm:$0xff]  ;;  %v711_v6 = vld [vmem:[#allocation2 + $0x10] sm:$0xff]  ;;  %vm198_vm2 = vcmask 1041409   ;;  %vm200_vm3 = vcmask 1042434   ;;  %vm202_vm4 = vcmask 1043459  }
   0xf   :  { %518 = vmatpush.msra.mxu1 %v64_v0  ;;  %520 = vmatpush.msra.mxu3 %v64_v0  ;;  %v707_v4 = vld [vmem:[#allocation2] sm:$0xff]  ;;  %v715_v7 = vld [vmem:[#allocation2 + $0x30] sm:$0xff]  ;;  %v723_v8 = vld [vmem:[#allocation2 + $0x8] sm:$0xff]  ;;  %v753_v57 = vand.u32 127, %v188_v55  ;;  %vm204_vm5 = vcmask 1044484   ;;  %vm206_vm6 = vcmask 1045509  }
  0x10   :  { %107 = vmatpush.msra.mxu0 %v63_v1  ;;  %522 = vmatpush.msra.mxu2 %v63_v1  ;;  %v709_v5 = vld [vmem:[#allocation2 + $0x20] sm:$0xff]  ;;  %v725_v9 = vld [vmem:[#allocation2 + $0x28] sm:$0xff]  ;;  %v727_v10 = vld [vmem:[#allocation2 + $0x18] sm:$0xff]  ;;  %vm208_vm7 = vcmask 1046534   ;;  %vm210_vm8 = vcmask 1047559   ;;  %vm213_vm9 = vcmask 64512  }
  0x11   :  { %521 = vmatpush.msra.mxu1 %v63_v1  ;;  %523 = vmatpush.msra.mxu3 %v63_v1  ;;  %v731_v11 = vld [vmem:[#allocation2 + $0x38] sm:$0xff]  ;;  %v540_v12 = vld [vmem:[%s839_s2] ss:$0 sm:$0xff]  ;;  %s669_s2 = smov [#allocation8]   ;;  %s494_s9 = sshll.u32 %s842_s5, 4  ;;  %s495_s9 = int_to_ptr.hbm [resolvable:$true] %s494_s9 }
  0x12   :  { %108 = vmatpush.msra.mxu0 %v62_v2  ;;  %525 = vmatpush.msra.mxu2 %v62_v2  ;;  %v541_v16 = vld [vmem:[%s840_s3] ss:$0 sm:$0xff]  ;;  %s492_s3 = sshll.u32 %s669_s2, 4  ;;  %s670_s5 = smov [#allocation7]   ;;  %s493_s3 = int_to_ptr.vmem [resolvable:$true] %s492_s3 }
  0x13   :  { %524 = vmatpush.msra.mxu1 %v62_v2  ;;  %526 = vmatpush.msra.mxu3 %v62_v2  ;;  %s481_s10 = sshll.u32 %s670_s5, 4  ;;  %s483_s13 = sshll.u32 %s841_s4, 4  ;;  %s482_s10 = int_to_ptr.vmem [resolvable:$true] %s481_s10  ;;  %s484_s13 = int_to_ptr.hbm [resolvable:$true] %s483_s13 }
  0x14   :  { %109 = vmatpush.msra.mxu0 %v61_v3  ;;  %528 = vmatpush.msra.mxu2 %v61_v3 }
  0x15   :  { %527 = vmatpush.msra.mxu1 %v61_v3  ;;  %510 = vmatmul.msk.f32.vlgmr.msra.gmra.mxu0 %vm69_vm0, %v707_v4 }
  0x16   :  { %514 = vmatmul.msk.f32.vlgmr.msra.gmra.mxu2 %vm69_vm0, %v709_v5  ;;  %512 = vmatmul.msk.f32.vlgmr.msra.gmra.mxu1 %vm69_vm0, %v711_v6 }
  0x17   :  { %529 = vmatpush.msra.mxu3 %v61_v3 }
  0x18   :  { %516 = vmatmul.msk.f32.vlgmr.msra.gmra.mxu3 %vm69_vm0, %v715_v7 }
  0x1d   :  { %511 = vmatmul.msk.f32.gmra.mxu0 %vm69_vm0, %v723_v8 }
  0x1e   :  { %515 = vmatmul.msk.f32.gmra.mxu2 %vm69_vm0, %v725_v9  ;;  %513 = vmatmul.msk.f32.gmra.mxu1 %vm69_vm0, %v727_v10 }
  0x20   :  { %517 = vmatmul.msk.f32.gmra.mxu3 %vm69_vm0, %v731_v11 }
  0x92   :  { %v111_v13 = vpop.f32.mrf.mxu0 }
  0x93   :  { %v112_v14 = vadd.f32 %v540_v12, %v111_v13  ;;  %v117_v15 = vpop.f32.mrf.mxu1 }
  0x94   :  { %v118_v17 = vadd.f32 %v540_v12, %v117_v15 }
  0x95   :  { %v135_v18 = vmax.f32 %v112_v14, 0.0 }
  0x96   :  { %v137_v19 = vmax.f32 %v118_v17, 0.0 }
  0x97   :  { %v147_v20 = vmul.f32 %v541_v16, %v135_v18 }
  0x98   :  { %v149_v21 = vmul.f32 %v541_v16, %v137_v19 }
  0x99   :  { %v123_v22 = vpop.f32.mrf.mxu2  ;;  %v156_v23 = vsel %vm155_vm1, %v147_v20, 0.0 }
  0x9a   :  { %v124_v24 = vadd.f32 %v540_v12, %v123_v22  ;;  %v114_v25 = vpop.f32.mrf.mxu0  ;;  %157 = vadd.xlane.f32.xlu0 %v156_v23  ;;  %v162_v26 = vsel %vm155_vm1, %v149_v21, 0.0 }
  0x9b   :  { %v115_v27 = vadd.f32 %v540_v12, %v114_v25  ;;  %v120_v28 = vpop.f32.mrf.mxu1  ;;  %v129_v29 = vpop.f32.mrf.mxu3  ;;  %163 = vadd.xlane.f32.xlu1 %v162_v26 }
  0x9c   :  { %v139_v30 = vmax.f32 %v124_v24, 0.0  ;;  %v121_v31 = vadd.f32 %v540_v12, %v120_v28  ;;  %v130_v33 = vadd.f32 %v540_v12, %v129_v29  ;;  %v668_v24 = vmov 0  }
  0x9d   :  { %v136_v32 = vmax.f32 %v115_v27, 0.0  ;;  %539 = vset.pattern.permute.xlu2 %v668_v24  ;;  %538 = vset.pattern.permute.xlu1 %v668_v24 }
  0x9e   :  { %v138_v34 = vmax.f32 %v121_v31, 0.0  ;;  %v151_v35 = vmul.f32 %v541_v16, %v139_v30  ;;  %v141_v39 = vmax.f32 %v130_v33, 0.0  ;;  %537 = vset.pattern.permute.xlu0 %v668_v24 }
  0x9f   :  { %v148_v36 = vmul.f32 %v541_v16, %v136_v32 }
  0xa0   :  { %v168_v37 = vsel %vm155_vm1, %v151_v35, 0.0  ;;  %v150_v38 = vmul.f32 %v541_v16, %v138_v34  ;;  %v153_v47 = vmul.f32 %v541_v16, %v141_v39 }
  0xa1   :  { %v126_v40 = vpop.f32.mrf.mxu2  ;;  %169 = vadd.xlane.f32.xlu2 %v168_v37  ;;  %v159_v41 = vsel %vm155_vm1, %v148_v36, 0.0 }
  0xa2   :  { %v127_v42 = vadd.f32 %v540_v12, %v126_v40  ;;  %160 = vadd.xlane.f32.xlu0 %v159_v41  ;;  %v165_v43 = vsel %vm155_vm1, %v150_v38, 0.0  ;;  %v174_v52 = vsel %vm155_vm1, %v153_v47, 0.0 }
  0xa3   :  { %v132_v44 = vpop.f32.mrf.mxu3  ;;  %166 = vadd.xlane.f32.xlu1 %v165_v43 }
  0xa4   :  { %v140_v45 = vmax.f32 %v127_v42, 0.0  ;;  %v133_v46 = vadd.f32 %v540_v12, %v132_v44 }
  0xa6   :  { %v142_v48 = vmax.f32 %v133_v46, 0.0  ;;  %v152_v49 = vmul.f32 %v541_v16, %v140_v45 }
  0xa8   :  { %v171_v50 = vsel %vm155_vm1, %v152_v49, 0.0  ;;  %v154_v51 = vmul.f32 %v541_v16, %v142_v48 }
  0xa9   :  { %172 = vadd.xlane.f32.xlu2 %v171_v50 }
  0xaa   :  { %175 = vadd.xlane.f32.xlu0 %v174_v52  ;;  %v177_v53 = vsel %vm155_vm1, %v154_v51, 0.0 }
  0xab   :  { %178 = vadd.xlane.f32.xlu1 %v177_v53 }
 0x10d   :  { %v158_v54 = vpop.xlane.xlu0 %157 }
 0x10e   :  { %v164_v56 = vpop.xlane.xlu1 %163  ;;  %v190_v60 = vperm.slane %v158_v54, %v753_v57 }
 0x10f   :  { %v192_v63 = vperm.slane %v164_v56, %v753_v57 }
 0x114   :  { %v170_v58 = vpop.xlane.xlu2 %169 }
 0x115   :  { %v161_v59 = vpop.xlane.xlu0 %160  ;;  %v194_v12 = vperm.slane %v170_v58, %v753_v57 }
 0x116   :  { %v191_v61 = vperm.slane %v161_v59, %v753_v57  ;;  %v167_v62 = vpop.xlane.xlu1 %166 }
 0x117   :  { %v193_v0 = vperm.slane %v167_v62, %v753_v57 }
 0x118   :  { %v199_v1 = vsel %vm198_vm2, %v191_v61, %v190_v60 }
 0x119   :  { %v201_v2 = vsel %vm200_vm3, %v192_v63, %v199_v1 }
 0x11a   :  { %v203_v3 = vsel %vm202_vm4, %v193_v0, %v201_v2 }
 0x11b   :  { %v205_v18 = vsel %vm204_vm5, %v194_v12, %v203_v3 }
 0x11c   :  { %v173_v13 = vpop.xlane.xlu2 %172 }
 0x11d   :  { %v195_v14 = vperm.slane %v173_v13, %v753_v57  ;;  %v176_v15 = vpop.xlane.xlu0 %175 }
 0x11e   :  { %v196_v16 = vperm.slane %v176_v15, %v753_v57  ;;  %v179_v17 = vpop.xlane.xlu1 %178 }
 0x11f   :  { %v197_v19 = vperm.slane %v179_v17, %v753_v57  ;;  %v207_v20 = vsel %vm206_vm6, %v195_v14, %v205_v18 }
 0x120   :  { %v209_v21 = vsel %vm208_vm7, %v196_v16, %v207_v20 }
 0x121   :  { %v211_v22 = vsel %vm210_vm8, %v197_v19, %v209_v21 }
 0x122   :  { %v214_v23 = vsel %vm213_vm9, %v211_v22, -inf }
 0x123   :  { %215 = vmax.xlane.f32.xlu2 %v214_v23 }
 0x196   :  { %v216_v25 = vpop.xlane.xlu2 %215 }
 0x197   :  { %v220_v26 = vperm.slane %v216_v25, 2  ;;  %v219_v27 = vperm.slane %v216_v25, 1  ;;  %v218_v28 = vperm.slane %v216_v25, 0  ;;  %v221_v32 = vperm.slane %v216_v25, 3 }
 0x198   :  { %v222_v33 = vperm.slane %v216_v25, 4  ;;  %v225_v34 = vperm.slane %v216_v25, 7  ;;  %v223_v42 = vperm.slane %v216_v25, 5  ;;  %v224_v44 = vperm.slane %v216_v25, 6 }
 0x199   :  { %v236_v29 = vsub.f32 %v164_v56, %v220_v26  ;;  %v235_v30 = vsub.f32 %v161_v59, %v219_v27  ;;  %v234_v31 = vsub.f32 %v158_v54, %v218_v28  ;;  %v237_v38 = vsub.f32 %v167_v62, %v221_v32 }
 0x19a   :  { %v238_v39 = vsub.f32 %v170_v58, %v222_v33  ;;  %v241_v40 = vsub.f32 %v179_v17, %v225_v34  ;;  %v239_v49 = vsub.f32 %v173_v13, %v223_v42  ;;  %v240_v50 = vsub.f32 %v176_v15, %v224_v44 }
 0x19b   :  { %v246_v35 = vmul.f32 1.442695, %v236_v29  ;;  %v244_v36 = vmul.f32 1.442695, %v235_v30  ;;  %v242_v37 = vmul.f32 1.442695, %v234_v31 }
 0x19c   :  { %v248_v41 = vmul.f32 1.442695, %v237_v38  ;;  %v250_v43 = vmul.f32 1.442695, %v238_v39  ;;  %v256_v46 = vmul.f32 1.442695, %v241_v40 }
 0x19d   :  { %542 = vpow2.f32 %v246_v35  ;;  %v252_v51 = vmul.f32 1.442695, %v239_v49  ;;  %v254_v52 = vmul.f32 1.442695, %v240_v50 }
 0x19e   :  { %544 = vpow2.f32 %v244_v36 }
 0x19f   :  { %546 = vpow2.f32 %v242_v37 }
 0x1a0   :  { %548 = vpow2.f32 %v248_v41 }
 0x1a1   :  { %550 = vpow2.f32 %v250_v43 }
 0x1a2   :  { %552 = vpow2.f32 %v256_v46 }
 0x1a3   :  { %v771_v45 = vpop.eup %542  ;;  %554 = vpow2.f32 %v252_v51 }
 0x1a4   :  { %v545_v47 = vpop.eup %544  ;;  %273 = vperm.xlu2 %539, %v771_v45   ;;  %556 = vpow2.f32 %v254_v52 }
 0x1a5   :  { %v547_v48 = vpop.eup %546  ;;  %270 = vperm.xlu1 %538, %v545_v47  }
 0x1a6   :  { %267 = vperm.xlu0 %537, %v547_v48   ;;  %v549_v53 = vpop.eup %548 }
 0x1a7   :  { %v551_v54 = vpop.eup %550 }
 0x1a8   :  { %v553_v55 = vpop.eup %552 }
 0x1a9   :  { %v555_v56 = vpop.eup %554 }
 0x1aa   :  { %v557_v58 = vpop.eup %556 }
 0x1ac   :  { %276 = vperm.xlu2 %539, %v549_v53  }
 0x1ad   :  { %279 = vperm.xlu1 %538, %v551_v54  }
 0x1ae   :  { %288 = vperm.xlu0 %537, %v553_v55  }
 0x1b4   :  { %282 = vperm.xlu2 %539, %v555_v56  }
 0x1b5   :  { %285 = vperm.xlu1 %538, %v557_v58  }
 0x1fe   :  { %v274_v59 = vpop.permute.xlu2 %273 }
 0x1ff   :  { %v292_v3 = vperm.slane %v274_v59, %v753_v57 }
 0x206   :  { %v277_v62 = vpop.permute.xlu2 %276 }
 0x207   :  { %v293_v14 = vperm.slane %v277_v62, %v753_v57 }
 0x20e   :  { %v283_v15 = vpop.permute.xlu2 %282 }
 0x20f   :  { %v295_v19 = vperm.slane %v283_v15, %v753_v57 }
 0x217   :  { %v271_v60 = vpop.permute.xlu1 %270 }
 0x218   :  { %v268_v61 = vpop.permute.xlu0 %267  ;;  %v291_v63 = vperm.slane %v271_v60, %v753_v57 }
 0x219   :  { %v290_v0 = vperm.slane %v268_v61, %v753_v57 }
 0x21b   :  { %v298_v1 = vsel %vm198_vm2, %v291_v63, %v290_v0 }
 0x21c   :  { %v299_v12 = vsel %vm200_vm3, %v292_v3, %v298_v1 }
 0x21d   :  { %v300_v16 = vsel %vm202_vm4, %v293_v14, %v299_v12 }
 0x21f   :  { %v280_v2 = vpop.permute.xlu1 %279 }
 0x220   :  { %v294_v13 = vperm.slane %v280_v2, %v753_v57  ;;  %v289_v18 = vpop.permute.xlu0 %288 }
 0x221   :  { %v297_v22 = vperm.slane %v289_v18, %v753_v57 }
 0x222   :  { %v301_v17 = vsel %vm204_vm5, %v294_v13, %v300_v16 }
 0x223   :  { %v302_v23 = vsel %vm206_vm6, %v295_v19, %v301_v17 }
 0x227   :  { %v286_v20 = vpop.permute.xlu1 %285 }
 0x228   :  { %v296_v21 = vperm.slane %v286_v20, %v753_v57 }
 0x22a   :  { %v303_v24 = vsel %vm208_vm7, %v296_v21, %v302_v23 }
 0x22b   :  { %v304_v25 = vsel %vm210_vm8, %v297_v22, %v303_v24 }
 0x22c   :  { %v306_v26 = vsel %vm213_vm9, %v304_v25, 0.0 }
 0x22d   :  { %307 = vadd.xlane.f32.xlu2 %v306_v26 }
 0x2a0   :  { %v308_v27 = vpop.xlane.xlu2 %307 }
 0x2a1   :  { %558 = vrcp.f32 %v308_v27 }
 0x2a7   :  { %v559_v28 = vpop.eup %558 }
 0x2a8   :  { %v310_v29 = vmul.f32 %v559_v28, %v308_v27 }
 0x2aa   :  { %v311_v30 = vsub.f32 2.0, %v310_v29 }
 0x2ac   :  { %v312_v31 = vmul.f32 %v559_v28, %v311_v30 }
 0x2ae   :  { %v315_v32 = vperm.slane %v312_v31, 1  ;;  %v314_v33 = vperm.slane %v312_v31, 0  ;;  %v317_v36 = vperm.slane %v312_v31, 3  ;;  %v316_v37 = vperm.slane %v312_v31, 2 }
 0x2af   :  { %v319_v40 = vperm.slane %v312_v31, 5  ;;  %v318_v41 = vperm.slane %v312_v31, 4  ;;  %v321_v44 = vperm.slane %v312_v31, 7  ;;  %v320_v46 = vperm.slane %v312_v31, 6 }
 0x2b0   :  { %v331_v34 = vmul.f32 %v545_v47, %v315_v32  ;;  %v330_v35 = vmul.f32 %v547_v48, %v314_v33  ;;  %v333_v38 = vmul.f32 %v549_v53, %v317_v36  ;;  %v332_v39 = vmul.f32 %v771_v45, %v316_v37 }
 0x2b1   :  { %v335_v42 = vmul.f32 %v555_v56, %v319_v40  ;;  %v334_v43 = vmul.f32 %v551_v54, %v318_v41  ;;  %v337_v49 = vmul.f32 %v553_v55, %v321_v44  ;;  %v336_v47 = vmul.f32 %v557_v58, %v320_v46 }
 0x2b2   :  { %345 = vperm.xlu0 %537, %v331_v34   ;;  %340 = vperm.xlu1 %538, %v330_v35  }
 0x2ba   :  { %355 = vperm.xlu0 %537, %v333_v38   ;;  %350 = vperm.xlu1 %538, %v332_v39  }
 0x2c2   :  { %365 = vperm.xlu0 %537, %v335_v42   ;;  %360 = vperm.xlu1 %538, %v334_v43  }
 0x2ca   :  { %375 = vperm.xlu0 %537, %v337_v49   ;;  %370 = vperm.xlu1 %538, %v336_v47  }
 0x324   :  { %v346_v48 = vpop.permute.xlu0 %345  ;;  %v341_v50 = vpop.permute.xlu1 %340 }
 0x325   :  { %v379_v51 = vmul.f32 %v346_v48, %v723_v8  ;;  %v378_v45 = vmul.f32 %v341_v50, %v707_v4  ;;  %v460_v63 = vperm.slane %v346_v48, %v753_v57  ;;  %v459_v1 = vperm.slane %v341_v50, %v753_v57 }
 0x327   :  { %v393_v52 = vsel %vm69_vm0, %v379_v51, 0.0  ;;  %v386_v53 = vsel %vm69_vm0, %v378_v45, 0.0 }
 0x328   :  { %v394_v56 = vrot.slane %v393_v52, 4  ;;  %v387_v54 = vrot.slane %v386_v53, 4 }
 0x32a   :  { %v395_v59 = vadd.f32 %v394_v56, %v393_v52  ;;  %v388_v62 = vadd.f32 %v387_v54, %v386_v53 }
 0x32c   :  { %v356_v60 = vpop.permute.xlu0 %355  ;;  %v351_v61 = vpop.permute.xlu1 %350  ;;  %v396_v0 = vrot.slane %v395_v59, 2  ;;  %v389_v12 = vrot.slane %v388_v62, 2 }
 0x32d   :  { %v381_v55 = vmul.f32 %v356_v60, %v727_v10  ;;  %v380_v58 = vmul.f32 %v351_v61, %v711_v6  ;;  %v461_v15 = vperm.slane %v351_v61, %v753_v57  ;;  %v467_v10 = vsel %vm198_vm2, %v460_v63, %v459_v1 }
 0x32e   :  { %v397_v16 = vadd.f32 %v396_v0, %v395_v59  ;;  %v390_v19 = vadd.f32 %v389_v12, %v388_v62  ;;  %v462_v20 = vperm.slane %v356_v60, %v753_v57 }
 0x32f   :  { %v407_v8 = vsel %vm69_vm0, %v381_v55, 0.0  ;;  %v400_v4 = vsel %vm69_vm0, %v380_v58, 0.0  ;;  %v468_v24 = vsel %vm200_vm3, %v461_v15, %v467_v10 }
 0x330   :  { %v408_v2 = vrot.slane %v407_v8, 4  ;;  %v401_v3 = vrot.slane %v400_v4, 4  ;;  %v398_v28 = vrot.slane %v397_v16, 1  ;;  %v391_v32 = vrot.slane %v390_v19, 1 }
 0x331   :  { %v469_v33 = vsel %vm202_vm4, %v462_v20, %v468_v24 }
 0x332   :  { %v409_v13 = vadd.f32 %v408_v2, %v407_v8  ;;  %v402_v14 = vadd.f32 %v401_v3, %v400_v4  ;;  %v399_v37 = vadd.f32 %v398_v28, %v397_v16  ;;  %v392_v47 = vadd.f32 %v391_v32, %v390_v19 }
 0x334   :  { %v403_v6 = vrot.slane %v402_v14, 2  ;;  %v366_v17 = vpop.permute.xlu0 %365  ;;  %v361_v18 = vpop.permute.xlu1 %360  ;;  %v410_v23 = vrot.slane %v409_v13, 2  ;;  %v450_v62 = vsel %vm198_vm2, %v399_v37, %v392_v47 }
 0x335   :  { %v383_v21 = vmul.f32 %v366_v17, %v725_v9  ;;  %v382_v22 = vmul.f32 %v361_v18, %v709_v5  ;;  %v463_v27 = vperm.slane %v361_v18, %v753_v57  ;;  %v464_v5 = vperm.slane %v366_v17, %v753_v57 }
 0x336   :  { %v404_v29 = vadd.f32 %v403_v6, %v402_v14  ;;  %v411_v34 = vadd.f32 %v410_v23, %v409_v13 }
 0x337   :  { %v421_v25 = vsel %vm69_vm0, %v383_v21, 0.0  ;;  %v414_v26 = vsel %vm69_vm0, %v382_v22, 0.0  ;;  %v470_v36 = vsel %vm204_vm5, %v463_v27, %v469_v33 }
 0x338   :  { %v422_v30 = vrot.slane %v421_v25, 4  ;;  %v415_v31 = vrot.slane %v414_v26, 4  ;;  %v405_v38 = vrot.slane %v404_v29, 1  ;;  %v412_v48 = vrot.slane %v411_v34, 1 }
 0x339   :  { %v471_v51 = vsel %vm206_vm6, %v464_v5, %v470_v36 }
 0x33a   :  { %v423_v9 = vadd.f32 %v422_v30, %v421_v25  ;;  %v416_v35 = vadd.f32 %v415_v31, %v414_v26  ;;  %v406_v53 = vadd.f32 %v405_v38, %v404_v29  ;;  %v413_v55 = vadd.f32 %v412_v48, %v411_v34 }
 0x33c   :  { %v424_v39 = vrot.slane %v423_v9, 2  ;;  %v417_v40 = vrot.slane %v416_v35, 2  ;;  %v376_v41 = vpop.permute.xlu0 %375  ;;  %v371_v42 = vpop.permute.xlu1 %370  ;;  %v451_v63 = vsel %vm200_vm3, %v406_v53, %v450_v62 }
 0x33d   :  { %v385_v43 = vmul.f32 %v376_v41, %v731_v11  ;;  %v466_v44 = vperm.slane %v376_v41, %v753_v57  ;;  %v384_v46 = vmul.f32 %v371_v42, %v715_v7  ;;  %v465_v49 = vperm.slane %v371_v42, %v753_v57 }
 0x33e   :  { %v418_v50 = vadd.f32 %v417_v40, %v416_v35  ;;  %v425_v45 = vadd.f32 %v424_v39, %v423_v9  ;;  %v452_v12 = vsel %vm202_vm4, %v413_v55, %v451_v63 }
 0x33f   :  { %v435_v11 = vsel %vm69_vm0, %v385_v43, 0.0  ;;  %v428_v52 = vsel %vm69_vm0, %v384_v46, 0.0  ;;  %v472_v7 = vsel %vm208_vm7, %v465_v49, %v471_v51 }
 0x340   :  { %v419_v57 = vrot.slane %v418_v50, 1  ;;  %v436_v56 = vrot.slane %v435_v11, 4  ;;  %v429_v54 = vrot.slane %v428_v52, 4  ;;  %v473_v59 = vsel %vm210_vm8, %v466_v44, %v472_v7 }
 0x341   :  { %475 = vst.msk [vmem:[#allocation8] sm:$0xff] %vm213_vm9, %v473_v59  ;;  %v426_v58 = vrot.slane %v425_v45, 1 }
 0x342   :  { %v437_v60 = vadd.f32 %v436_v56, %v435_v11  ;;  %v430_v61 = vadd.f32 %v429_v54, %v428_v52  ;;  %497 = dma.vmem_to_hbm [thread:$0]  %s493_s3, 128, %s495_s9, [#allocation9]   ;;  %v420_v8 = vadd.f32 %v419_v57, %v418_v50 }
 0x343   :  { %v427_v3 = vadd.f32 %v426_v58, %v425_v45 }
 0x344   :  { %v438_v4 = vrot.slane %v437_v60, 2  ;;  %v431_v0 = vrot.slane %v430_v61, 2  ;;  %v453_v15 = vsel %vm204_vm5, %v420_v8, %v452_v12 }
 0x345   :  { %v454_v6 = vsel %vm206_vm6, %v427_v3, %v453_v15 }
 0x346   :  { %v439_v1 = vadd.f32 %v438_v4, %v437_v60  ;;  %v432_v2 = vadd.f32 %v431_v0, %v430_v61 }
 0x348   :  { %v440_v13 = vrot.slane %v439_v1, 1  ;;  %v433_v14 = vrot.slane %v432_v2, 1 }
 0x34a   :  { %v441_v16 = vadd.f32 %v440_v13, %v439_v1  ;;  %v434_v10 = vadd.f32 %v433_v14, %v432_v2 }
 0x34c   :  { %v455_v17 = vsel %vm208_vm7, %v434_v10, %v454_v6 }
 0x34d   :  { %v456_v18 = vsel %vm210_vm8, %v441_v16, %v455_v17 }
 0x34e   :  { %458 = vst.msk [vmem:[#allocation7] sm:$0xff] %vm69_vm0, %v456_v18 }
 0x34f   :  { %486 = dma.vmem_to_hbm [thread:$0]  %s482_s10, 128, %s484_s13, [#allocation4]  }
 0x350   :  { %660 = dma.done.wait [#allocation4], 128  }
 0x351   :  { %661 = vsyncadd [#allocation4], 4294967168 }
 0x352   :  { %662 = dma.done.wait [#allocation9], 128  }
 0x353   :  { %663 = vsyncadd [#allocation9], 4294967168 }
 0x354   :  { %506 = vsyncpa [#allocation3], 1 }
 0x355   :  { %507 = vsyncpa [#allocation6], 1 }
 0x356   :  { %508 = vsyncpa [#allocation4], 1 }
 0x357   :  { %509 = vsyncpa [#allocation9], 1 }

</bundles_post_ra>
